<compile_context>
chip_gen: v7x
topology: tpu7x:2x2x1
jax: 0.10.0
libtpu: 0.0.40
codegen_flags: <defaults>
</compile_context>

<pallas_src>
import functools

import jax
import jax.numpy as jnp
from jax import lax
from jax.experimental import pallas as pl
from jax.experimental.pallas import tpu as pltpu

EPS = 1e-5
STRIDE = 2


def unet_down_kernel(ph_ref, w_ref, out_ref, *, K, OH, OW, eps):
    """Fused stride-2 Conv2d + InstanceNorm2d(affine=False) + ReLU for one
    (batch, OC-tile) grid step.

    ph_ref : (1, 4, C, PR, PC)  the 4 stride-2 phases of the padded input
    w_ref  : (K*K, toc, C)      conv weight, tap-major
    out_ref: (1, toc, P)        output, lane-dense along P = OH*OW
    """
    toc = w_ref.shape[1]
    C = w_ref.shape[2]
    P = OH * OW

    # Conv as K*K shifted MXU matmuls over stride-1 slices of the phases.
    acc = jnp.zeros((toc, P), jnp.float32)
    for ph in range(STRIDE):                      # row parity of the tap
        for pw in range(STRIDE):                  # col parity of the tap
            phase = ph_ref[0, ph * STRIDE + pw]   # (C, PR, PC); stride-1 below
            for kh in range(ph, K, STRIDE):
                for kw in range(pw, K, STRIDE):
                    r0, c0 = kh // STRIDE, kw // STRIDE
                    tap = phase[:, r0:r0 + OH, c0:c0 + OW].reshape(C, P)
                    acc = acc + jnp.dot(w_ref[kh * K + kw], tap,
                                        preferred_element_type=jnp.float32)

    # InstanceNorm2d (biased variance, centered two-pass for accuracy) + ReLU.
    mean = jnp.mean(acc, axis=1, keepdims=True)          # (toc, 1)
    xc = acc - mean
    var = jnp.mean(xc * xc, axis=1, keepdims=True)       # biased variance
    y = xc * lax.rsqrt(var + eps)                        # EUP rsqrt
    out_ref[0] = jnp.maximum(y, 0.0).astype(out_ref.dtype)


def _choose_oc_tile(OC, fits, prefer_split):
    """Largest multiple-of-8 divisor of OC (or OC itself) whose per-step VMEM
    footprint fits; prefer >=2 tiles when prefer_split (v7x megacore, N==1)."""
    cands = []
    if not (prefer_split and OC % 16 == 0 and OC >= 16):
        cands.append(OC)
    if OC % 8 == 0:
        d = OC // 2
        while d >= 8:
            if OC % d == 0:
                cands.append(d)
            d -= 8
    if not cands:
        cands = [OC]
    for toc in cands:
        if fits(toc):
            return toc
    return cands[-1]


def unet_down(x, weight, bias, *, stride=2, padding=1,
              compute_dtype=jnp.bfloat16, out_dtype=jnp.float32):
    """UNetDown forward:  conv(k=3, s=2, p=1) -> InstanceNorm2d -> ReLU.

    x: (N, C, H, W) f32; weight: (OC, C, K, K); bias: (OC,).
    The conv bias is dropped: InstanceNorm2d(affine=False) subtracts the
    per-channel spatial mean, so a per-channel constant cancels exactly.
    Returns (N, OC, OH, OW) in out_dtype.
    """
    del bias  # cancels exactly under affine=False InstanceNorm (mean subtraction)
    assert stride == STRIDE, "kernel is specialized for stride=2"
    N, C, H, W = x.shape
    OC, wc, K, K2 = weight.shape
    assert wc == C and K == K2
    OH = (H + 2 * padding - K) // stride + 1
    OW = (W + 2 * padding - K) // stride + 1
    P = OH * OW
    KK = K * K

    # Phase extents: enough rows/cols for the largest static tap offset (K-1)//2.
    PR = OH + (K - 1) // 2
    PC = OW + (K - 1) // 2

    # Cast FIRST (halves every downstream byte when bf16), then pad so every
    # stride-2 phase has exactly (PR, PC) rows/cols.  Any extra zero rows/cols
    # beyond the conv's reach are never addressed by a tap in the kernel.
    xc = x.astype(compute_dtype)
    pad_b = stride * PR - H - padding
    pad_r = stride * PC - W - padding
    xp = jnp.pad(xc, ((0, 0), (0, 0), (padding, pad_b), (padding, pad_r)))

    # (N, 4, C, PR, PC): the stride-2 phases — just a reorganisation of the
    # padded input (~1x input bytes), no im2col blowup.
    phases = jnp.stack(
        [xp[:, :, ph::stride, pw::stride]
         for ph in range(stride) for pw in range(stride)],
        axis=1)

    # Weight, tap-major: (K*K, OC, C) so w_ref[kh*K + kw] is a dense (toc, C) tile.
    w2 = weight.transpose(2, 3, 0, 1).reshape(KK, OC, C).astype(compute_dtype)

    in_item = jnp.dtype(compute_dtype).itemsize
    out_item = jnp.dtype(out_dtype).itemsize

    # Per-generation VMEM cap (no artificial 64 MiB min on v5e/v6e).
    try:
        vmem_cap = int(pltpu.get_tpu_info().vmem_capacity_bytes)
    except Exception:
        vmem_cap = 64 << 20          # safe on every generation (v7x has 64 MiB)
    vmem_cap = max(vmem_cap, 32 << 20)

    ph_block = stride * stride * C * PR * PC * in_item

    def step_bytes(toc):
        return (2 * ph_block                      # double-buffered phase block
                + 2 * KK * toc * C * in_item      # double-buffered weight tile
                + 2 * toc * P * out_item          # double-buffered output tile
                + toc * P * 4                     # f32 conv/norm workspace
                + 2 * C * P * 4)                  # tap relayout temporaries

    budget = int(vmem_cap * 0.7)
    toc = _choose_oc_tile(OC, lambda t: step_bytes(t) <= budget,
                          prefer_split=(N == 1))
    n_oc = OC // toc

    vmem_limit = int(min(vmem_cap - (8 << 20),
                         max(48 << 20, 2 * step_bytes(toc))))

    cost = pl.CostEstimate(
        flops=2 * N * OC * C * KK * P + 8 * N * OC * P,
        transcendentals=N * OC,
        bytes_accessed=int(phases.size) * in_item
                       + n_oc * int(w2.size) * in_item
                       + N * OC * P * out_item)

    out = pl.pallas_call(
        functools.partial(unet_down_kernel, K=K, OH=OH, OW=OW, eps=EPS),
        out_shape=jax.ShapeDtypeStruct((N, OC, P), out_dtype),
        grid_spec=pltpu.PrefetchScalarGridSpec(
            num_scalar_prefetch=0,
            grid=(N, n_oc),                               # both axes independent
            in_specs=[
                pl.BlockSpec((1, stride * stride, C, PR, PC),
                             lambda n, j: (n, 0, 0, 0, 0)),
                pl.BlockSpec((KK, toc, C), lambda n, j: (0, j, 0)),
            ],
            out_specs=pl.BlockSpec((1, toc, P), lambda n, j: (n, j, 0)),
        ),
        compiler_params=pltpu.CompilerParams(
            dimension_semantics=("parallel", "parallel"),
            vmem_limit_bytes=vmem_limit,
        ),
        cost_estimate=cost,
    )(phases, w2)

    # Lane-dense (N, OC, P) -> NCHW is a pure reshape (no HBM transpose).
    return out.reshape(N, OC, OH, OW)


def _reference(x, weight, bias):
    """Pure-JAX reference: conv2d(stride=2, pad=1) + InstanceNorm2d + ReLU."""
    y = lax.conv_general_dilated(
        x, weight, window_strides=(2, 2), padding=((1, 1), (1, 1)),
        dimension_numbers=("NCHW", "OIHW", "NCHW"))
    y = y + bias.reshape(1, -1, 1, 1)
    mean = jnp.mean(y, axis=(2, 3), keepdims=True)
    var = jnp.mean((y - mean) ** 2, axis=(2, 3), keepdims=True)
    y = (y - mean) / jnp.sqrt(var + EPS)
    return jnp.maximum(y, 0.0)


if __name__ == "__main__":
    key = jax.random.PRNGKey(0)
    kx, kw, kb = jax.random.split(key, 3)

    N, C, H, W = 2, 4, 16, 16
    OC, K = 8, 3

    x = jax.random.normal(kx, (N, C, H, W), dtype=jnp.float32)
    fan_in = C * K * K
    bound = 1.0 / (fan_in ** 0.5)
    weight = jax.random.uniform(kw, (OC, C, K, K), jnp.float32, -bound, bound)
    bias = jax.random.uniform(kb, (OC,), jnp.float32, -bound, bound)

    ref = _reference(x, weight, bias)

    # f32 matmul-operand path (tight correctness check).
    out_f32 = jax.block_until_ready(
        unet_down(x, weight, bias, compute_dtype=jnp.float32))
    assert out_f32.shape == (N, OC, H // 2, W // 2), out_f32.shape
    err = float(jnp.max(jnp.abs(out_f32 - ref)))
    assert err < 2e-4, err

    # Default path: bf16 MXU operands, f32 accumulation / norm math.
    out_bf16 = jax.block_until_ready(unet_down(x, weight, bias))
    assert out_bf16.shape == (N, OC, H // 2, W // 2), out_bf16.shape
    err_bf = float(jnp.max(jnp.abs(out_bf16 - ref)))
    assert err_bf < 1e-1, err_bf

    print("KERNEL_OK")
</pallas_src>

<mosaic_0001>
module attributes {stable_mosaic.version = 11 : i64} {
  func.func @unet_down_kernel(%arg0: i32, %arg1: i32, %arg2: memref<1x4x4x9x9xf32, #tpu.memory_space<vmem>>, %arg3: memref<9x8x4xf32, #tpu.memory_space<vmem>>, %arg4: memref<1x8x64xf32, #tpu.memory_space<vmem>>) attributes {dimension_semantics = [#tpu.dimension_semantics<parallel>, #tpu.dimension_semantics<parallel>], iteration_bounds = array<i64: 2, 1>, scalar_prefetch = 0 : i64, scratch_operands = 0 : i64, tpu.core_type = #tpu.core_type<tc>, window_params = [{transform_indices = @transform_0, window_bounds = array<i64: 1, 4, 4, 9, 9>}, {transform_indices = @transform_1, window_bounds = array<i64: 9, 8, 4>}, {transform_indices = @transform_2, window_bounds = array<i64: 1, 8, 64>}]} {
    %cst = arith.constant 0.000000e+00 : f32
    %0 = vector.broadcast %cst : f32 to vector<8x64xf32>
    %c0 = arith.constant 0 : index
    %c0_0 = arith.constant 0 : index
    %c0_1 = arith.constant 0 : index
    %c0_2 = arith.constant 0 : index
    %c0_3 = arith.constant 0 : index
    %1 = vector.load %arg2[%c0, %c0_0, %c0_1, %c0_2, %c0_3] : memref<1x4x4x9x9xf32, #tpu.memory_space<vmem>>, vector<1x1x4x9x9xf32>
    %2 = vector.shape_cast %1 : vector<1x1x4x9x9xf32> to vector<4x9x9xf32>
    %3 = vector.extract_strided_slice %2 {offsets = [0, 0, 0], sizes = [4, 8, 8], strides = [1, 1, 1]} : vector<4x9x9xf32> to vector<4x8x8xf32>
    %4 = vector.shape_cast %3 : vector<4x8x8xf32> to vector<4x64xf32>
    %c0_4 = arith.constant 0 : index
    %c0_5 = arith.constant 0 : index
    %c0_6 = arith.constant 0 : index
    %5 = vector.load %arg3[%c0_4, %c0_5, %c0_6] : memref<9x8x4xf32, #tpu.memory_space<vmem>>, vector<1x8x4xf32>
    %6 = vector.shape_cast %5 : vector<1x8x4xf32> to vector<8x4xf32>
    %cst_7 = arith.constant dense<0.000000e+00> : vector<8x64xf32>
    %7 = tpu.matmul %6, %4, %cst_7 {dimension_numbers = #tpu.dot_dimension_numbers<[1], [0], [0], [1], [0, 0, 1, 1], [], []>} : vector<8x4xf32>, vector<4x64xf32>, vector<8x64xf32> -> vector<8x64xf32>
    %8 = arith.addf %0, %7 : vector<8x64xf32>
    %9 = vector.extract_strided_slice %2 {offsets = [0, 0, 1], sizes = [4, 8, 8], strides = [1, 1, 1]} : vector<4x9x9xf32> to vector<4x8x8xf32>
    %10 = vector.shape_cast %9 : vector<4x8x8xf32> to vector<4x64xf32>
    %c2 = arith.constant 2 : index
    %c0_8 = arith.constant 0 : index
    %c0_9 = arith.constant 0 : index
    %11 = vector.load %arg3[%c2, %c0_8, %c0_9] : memref<9x8x4xf32, #tpu.memory_space<vmem>>, vector<1x8x4xf32>
    %12 = vector.shape_cast %11 : vector<1x8x4xf32> to vector<8x4xf32>
    %cst_10 = arith.constant dense<0.000000e+00> : vector<8x64xf32>
    %13 = tpu.matmul %12, %10, %cst_10 {dimension_numbers = #tpu.dot_dimension_numbers<[1], [0], [0], [1], [0, 0, 1, 1], [], []>} : vector<8x4xf32>, vector<4x64xf32>, vector<8x64xf32> -> vector<8x64xf32>
    %14 = arith.addf %8, %13 : vector<8x64xf32>
    %15 = vector.extract_strided_slice %2 {offsets = [0, 1, 0], sizes = [4, 8, 8], strides = [1, 1, 1]} : vector<4x9x9xf32> to vector<4x8x8xf32>
    %16 = vector.shape_cast %15 : vector<4x8x8xf32> to vector<4x64xf32>
    %c6 = arith.constant 6 : index
    %c0_11 = arith.constant 0 : index
    %c0_12 = arith.constant 0 : index
    %17 = vector.load %arg3[%c6, %c0_11, %c0_12] : memref<9x8x4xf32, #tpu.memory_space<vmem>>, vector<1x8x4xf32>
    %18 = vector.shape_cast %17 : vector<1x8x4xf32> to vector<8x4xf32>
    %cst_13 = arith.constant dense<0.000000e+00> : vector<8x64xf32>
    %19 = tpu.matmul %18, %16, %cst_13 {dimension_numbers = #tpu.dot_dimension_numbers<[1], [0], [0], [1], [0, 0, 1, 1], [], []>} : vector<8x4xf32>, vector<4x64xf32>, vector<8x64xf32> -> vector<8x64xf32>
    %20 = arith.addf %14, %19 : vector<8x64xf32>
    %21 = vector.extract_strided_slice %2 {offsets = [0, 1, 1], sizes = [4, 8, 8], strides = [1, 1, 1]} : vector<4x9x9xf32> to vector<4x8x8xf32>
    %22 = vector.shape_cast %21 : vector<4x8x8xf32> to vector<4x64xf32>
    %c8 = arith.constant 8 : index
    %c0_14 = arith.constant 0 : index
    %c0_15 = arith.constant 0 : index
    %23 = vector.load %arg3[%c8, %c0_14, %c0_15] : memref<9x8x4xf32, #tpu.memory_space<vmem>>, vector<1x8x4xf32>
    %24 = vector.shape_cast %23 : vector<1x8x4xf32> to vector<8x4xf32>
    %cst_16 = arith.constant dense<0.000000e+00> : vector<8x64xf32>
    %25 = tpu.matmul %24, %22, %cst_16 {dimension_numbers = #tpu.dot_dimension_numbers<[1], [0], [0], [1], [0, 0, 1, 1], [], []>} : vector<8x4xf32>, vector<4x64xf32>, vector<8x64xf32> -> vector<8x64xf32>
    %26 = arith.addf %20, %25 : vector<8x64xf32>
    %c0_17 = arith.constant 0 : index
    %c1 = arith.constant 1 : index
    %c0_18 = arith.constant 0 : index
    %c0_19 = arith.constant 0 : index
    %c0_20 = arith.constant 0 : index
    %27 = vector.load %arg2[%c0_17, %c1, %c0_18, %c0_19, %c0_20] : memref<1x4x4x9x9xf32, #tpu.memory_space<vmem>>, vector<1x1x4x9x9xf32>
    %28 = vector.shape_cast %27 : vector<1x1x4x9x9xf32> to vector<4x9x9xf32>
    %29 = vector.extract_strided_slice %28 {offsets = [0, 0, 0], sizes = [4, 8, 8], strides = [1, 1, 1]} : vector<4x9x9xf32> to vector<4x8x8xf32>
    %30 = vector.shape_cast %29 : vector<4x8x8xf32> to vector<4x64xf32>
    %c1_21 = arith.constant 1 : index
    %c0_22 = arith.constant 0 : index
    %c0_23 = arith.constant 0 : index
    %31 = vector.load %arg3[%c1_21, %c0_22, %c0_23] : memref<9x8x4xf32, #tpu.memory_space<vmem>>, vector<1x8x4xf32>
    %32 = vector.shape_cast %31 : vector<1x8x4xf32> to vector<8x4xf32>
    %cst_24 = arith.constant dense<0.000000e+00> : vector<8x64xf32>
    %33 = tpu.matmul %32, %30, %cst_24 {dimension_numbers = #tpu.dot_dimension_numbers<[1], [0], [0], [1], [0, 0, 1, 1], [], []>} : vector<8x4xf32>, vector<4x64xf32>, vector<8x64xf32> -> vector<8x64xf32>
    %34 = arith.addf %26, %33 : vector<8x64xf32>
    %35 = vector.extract_strided_slice %28 {offsets = [0, 1, 0], sizes = [4, 8, 8], strides = [1, 1, 1]} : vector<4x9x9xf32> to vector<4x8x8xf32>
    %36 = vector.shape_cast %35 : vector<4x8x8xf32> to vector<4x64xf32>
    %c7 = arith.constant 7 : index
    %c0_25 = arith.constant 0 : index
    %c0_26 = arith.constant 0 : index
    %37 = vector.load %arg3[%c7, %c0_25, %c0_26] : memref<9x8x4xf32, #tpu.memory_space<vmem>>, vector<1x8x4xf32>
    %38 = vector.shape_cast %37 : vector<1x8x4xf32> to vector<8x4xf32>
    %cst_27 = arith.constant dense<0.000000e+00> : vector<8x64xf32>
    %39 = tpu.matmul %38, %36, %cst_27 {dimension_numbers = #tpu.dot_dimension_numbers<[1], [0], [0], [1], [0, 0, 1, 1], [], []>} : vector<8x4xf32>, vector<4x64xf32>, vector<8x64xf32> -> vector<8x64xf32>
    %40 = arith.addf %34, %39 : vector<8x64xf32>
    %c0_28 = arith.constant 0 : index
    %c2_29 = arith.constant 2 : index
    %c0_30 = arith.constant 0 : index
    %c0_31 = arith.constant 0 : index
    %c0_32 = arith.constant 0 : index
    %41 = vector.load %arg2[%c0_28, %c2_29, %c0_30, %c0_31, %c0_32] : memref<1x4x4x9x9xf32, #tpu.memory_space<vmem>>, vector<1x1x4x9x9xf32>
    %42 = vector.shape_cast %41 : vector<1x1x4x9x9xf32> to vector<4x9x9xf32>
    %43 = vector.extract_strided_slice %42 {offsets = [0, 0, 0], sizes = [4, 8, 8], strides = [1, 1, 1]} : vector<4x9x9xf32> to vector<4x8x8xf32>
    %44 = vector.shape_cast %43 : vector<4x8x8xf32> to vector<4x64xf32>
    %c3 = arith.constant 3 : index
    %c0_33 = arith.constant 0 : index
    %c0_34 = arith.constant 0 : index
    %45 = vector.load %arg3[%c3, %c0_33, %c0_34] : memref<9x8x4xf32, #tpu.memory_space<vmem>>, vector<1x8x4xf32>
    %46 = vector.shape_cast %45 : vector<1x8x4xf32> to vector<8x4xf32>
    %cst_35 = arith.constant dense<0.000000e+00> : vector<8x64xf32>
    %47 = tpu.matmul %46, %44, %cst_35 {dimension_numbers = #tpu.dot_dimension_numbers<[1], [0], [0], [1], [0, 0, 1, 1], [], []>} : vector<8x4xf32>, vector<4x64xf32>, vector<8x64xf32> -> vector<8x64xf32>
    %48 = arith.addf %40, %47 : vector<8x64xf32>
    %49 = vector.extract_strided_slice %42 {offsets = [0, 0, 1], sizes = [4, 8, 8], strides = [1, 1, 1]} : vector<4x9x9xf32> to vector<4x8x8xf32>
    %50 = vector.shape_cast %49 : vector<4x8x8xf32> to vector<4x64xf32>
    %c5 = arith.constant 5 : index
    %c0_36 = arith.constant 0 : index
    %c0_37 = arith.constant 0 : index
    %51 = vector.load %arg3[%c5, %c0_36, %c0_37] : memref<9x8x4xf32, #tpu.memory_space<vmem>>, vector<1x8x4xf32>
    %52 = vector.shape_cast %51 : vector<1x8x4xf32> to vector<8x4xf32>
    %cst_38 = arith.constant dense<0.000000e+00> : vector<8x64xf32>
    %53 = tpu.matmul %52, %50, %cst_38 {dimension_numbers = #tpu.dot_dimension_numbers<[1], [0], [0], [1], [0, 0, 1, 1], [], []>} : vector<8x4xf32>, vector<4x64xf32>, vector<8x64xf32> -> vector<8x64xf32>
    %54 = arith.addf %48, %53 : vector<8x64xf32>
    %c0_39 = arith.constant 0 : index
    %c3_40 = arith.constant 3 : index
    %c0_41 = arith.constant 0 : index
    %c0_42 = arith.constant 0 : index
    %c0_43 = arith.constant 0 : index
    %55 = vector.load %arg2[%c0_39, %c3_40, %c0_41, %c0_42, %c0_43] : memref<1x4x4x9x9xf32, #tpu.memory_space<vmem>>, vector<1x1x4x9x9xf32>
    %56 = vector.shape_cast %55 : vector<1x1x4x9x9xf32> to vector<4x9x9xf32>
    %57 = vector.extract_strided_slice %56 {offsets = [0, 0, 0], sizes = [4, 8, 8], strides = [1, 1, 1]} : vector<4x9x9xf32> to vector<4x8x8xf32>
    %58 = vector.shape_cast %57 : vector<4x8x8xf32> to vector<4x64xf32>
    %c4 = arith.constant 4 : index
    %c0_44 = arith.constant 0 : index
    %c0_45 = arith.constant 0 : index
    %59 = vector.load %arg3[%c4, %c0_44, %c0_45] : memref<9x8x4xf32, #tpu.memory_space<vmem>>, vector<1x8x4xf32>
    %60 = vector.shape_cast %59 : vector<1x8x4xf32> to vector<8x4xf32>
    %cst_46 = arith.constant dense<0.000000e+00> : vector<8x64xf32>
    %61 = tpu.matmul %60, %58, %cst_46 {dimension_numbers = #tpu.dot_dimension_numbers<[1], [0], [0], [1], [0, 0, 1, 1], [], []>} : vector<8x4xf32>, vector<4x64xf32>, vector<8x64xf32> -> vector<8x64xf32>
    %62 = arith.addf %54, %61 : vector<8x64xf32>
    %cst_47 = arith.constant dense<0.000000e+00> : vector<8xf32>
    %63 = vector.multi_reduction <add>, %62, %cst_47 [1] : vector<8x64xf32> to vector<8xf32>
    %64 = vector.shape_cast %63 : vector<8xf32> to vector<8x1xf32>
    %cst_48 = arith.constant 6.400000e+01 : f32
    %65 = vector.broadcast %cst_48 : f32 to vector<8x1xf32>
    %66 = arith.divf %64, %65 : vector<8x1xf32>
    %67 = vector.broadcast %66 : vector<8x1xf32> to vector<8x64xf32>
    %68 = arith.subf %62, %67 : vector<8x64xf32>
    %69 = arith.mulf %68, %68 : vector<8x64xf32>
    %cst_49 = arith.constant dense<0.000000e+00> : vector<8xf32>
    %70 = vector.multi_reduction <add>, %69, %cst_49 [1] : vector<8x64xf32> to vector<8xf32>
    %71 = vector.shape_cast %70 : vector<8xf32> to vector<8x1xf32>
    %cst_50 = arith.constant 6.400000e+01 : f32
    %72 = vector.broadcast %cst_50 : f32 to vector<8x1xf32>
    %73 = arith.divf %71, %72 : vector<8x1xf32>
    %cst_51 = arith.constant 9.99999974E-6 : f32
    %74 = vector.broadcast %cst_51 : f32 to vector<8x1xf32>
    %75 = arith.addf %73, %74 : vector<8x1xf32>
    %76 = math.rsqrt %75 : vector<8x1xf32>
    %77 = vector.broadcast %76 : vector<8x1xf32> to vector<8x64xf32>
    %78 = arith.mulf %68, %77 : vector<8x64xf32>
    %cst_52 = arith.constant 0.000000e+00 : f32
    %79 = vector.broadcast %cst_52 : f32 to vector<8x64xf32>
    %80 = arith.maximumf %78, %79 : vector<8x64xf32>
    %c0_53 = arith.constant 0 : index
    %c0_54 = arith.constant 0 : index
    %c0_55 = arith.constant 0 : index
    %81 = vector.load %arg4[%c0_53, %c0_54, %c0_55] : memref<1x8x64xf32, #tpu.memory_space<vmem>>, vector<1x8x64xf32>
    %82 = vector.shape_cast %81 : vector<1x8x64xf32> to vector<8x64xf32>
    %83 = vector.shape_cast %80 : vector<8x64xf32> to vector<1x8x64xf32>
    tpu.vector_store %arg4[%c0_53, %c0_54, %c0_55], %83 {strides = array<i32>} : memref<1x8x64xf32, #tpu.memory_space<vmem>>, vector<1x8x64xf32>,
    return
  }
  func.func @transform_0(%arg0: i32, %arg1: i32) -> (i32, i32, i32, i32, i32) {
    %c0_i32 = arith.constant 0 : i32
    %c0_i32_0 = arith.constant 0 : i32
    %c0_i32_1 = arith.constant 0 : i32
    %c0_i32_2 = arith.constant 0 : i32
    %c0_i32_3 = arith.constant 0 : i32
    return %arg0, %c0_i32, %c0_i32_0, %c0_i32_1, %c0_i32_2 : i32, i32, i32, i32, i32
  }
  func.func @transform_1(%arg0: i32, %arg1: i32) -> (i32, i32, i32) {
    %c0_i32 = arith.constant 0 : i32
    %c0_i32_0 = arith.constant 0 : i32
    %c0_i32_1 = arith.constant 0 : i32
    return %c0_i32, %arg1, %c0_i32_0 : i32, i32, i32
  }
  func.func @transform_2(%arg0: i32, %arg1: i32) -> (i32, i32, i32) {
    %c0_i32 = arith.constant 0 : i32
    %c0_i32_0 = arith.constant 0 : i32
    return %arg0, %arg1, %c0_i32 : i32, i32, i32
  }
}

</mosaic_0001>

<bundles_post_ra>
// kernel: tpu_custom_call.1
= control target key start
LH: loop header
LB: loop body
LE: loop exit
PB: predicated region body
PF: predicated region fallthrough
CT: control target
= control target key end

     0   :  { %7 = vsyncpa [#allocation3], 0  ;;  %s3002_s0 = inlined_call_operand.vmem [shape: f32[2,4,4,9,9], index: 0, kind: input, shape index: {}]   ;;  %s3003_s1 = inlined_call_operand.vmem [shape: f32[9,8,4], index: 1, kind: input, shape index: {}]   ;;  %s3004_s2 = inlined_call_operand.hbm [shape: f32[2,8,64], index: 2, kind: output, shape index: {}]  }
   0x1   :  { %9 = vsyncpa [#allocation3 + $0x1], 0  ;;  %s2359_s9 = smov 0   ;;  %s2361_s10 = smov 0  }
   0x2   :  { %s2363_s11 = smov 0   ;;  %s2365_s12 = smov 0  }
   0x3   :  { %s2367_s13 = smov 0   ;;  %s2369_s14 = smov 0  }
   0x4 LB: > { %s2048_s15 = sadd.s32 4294967295, %s2329_s14   ;;  %s2049_s16 = sadd.s32 4294967294, %s2329_s14   ;;  %s2329_s14 = sphi %s2369_s14, %s15_s14   ;;  %s2325_s13 = sphi %s2367_s13, %s3011_s13   ;;  %s2321_s12 = sphi %s2365_s12, %s3010_s12   ;;  %s2317_s11 = sphi %s2363_s11, %s3009_s11   ;;  %s2313_s10 = sphi %s2361_s10, %s3008_s10   ;;  %s2309_s9 = sphi %s2359_s9, %s3007_s9  }
   0x5   : > { %s27_s17 = sadd.s32 1, %s2325_s13  ;;  %s88_s18 = sadd.s32 1, %s2317_s11 }
   0x6   : > { %p29_p0 = scmp.ge.s32.totalorder %s27_s17, 2  ;;  %p98_p1 = scmp.ne.s32.totalorder %s2317_s11, %s2313_s10 }
   0x7   : > { %p99_p2 = scmp.eq.s32.totalorder %s2048_s15, 1  ;;  %p104_p3 = scmp.ne.s32.totalorder %s2313_s10, %s2309_s9 }
   0x8   : > { %s3013_s17 = smov (%p29_p0, %s27_s17), 0  ;;  %p105_p5 = scmp.eq.s32.totalorder %s2049_s16, 1 }
   0x9   : > { %p2399_p4 = por %p99_p2, %p98_p1  ;;  %s83_s20 = ssub.s32 %s2325_s13, %s3013_s17 }
   0xa   : > { %p2053_p6 = scmp.ge.s32.totalorder %s2329_s14, 1  ;;  %p86_p7 = scmp.eq.s32.totalorder %s83_s20, 0 }
   0xb   : > { %p2406_p8 = por %p105_p5, %p104_p3  ;;  %p138_p9 = scmp.lt.s32.totalorder %s2329_s14, 3 }
   0xc   : > { %s2412_s22 = scalar_select %p86_p7, %s2317_s11, %s88_s18  }
   0xd   : > { %p139_p10 = pnand %p2053_p6, %p138_p9 }
   0xe   : > { %p164_p11 = scmp.lt.s32.totalorder (!%p139_p10), %s2321_s12, 1  ;;  %v2331_v0 = vmov (!%p139_p10), 0.0   ;;  %v2332_v1 = vmov (!%p139_p10), 1983009808   ;;  %v186_v3 = vlaneseq (!%p139_p10)  ;;  %s2333_s28 = smov (!%p139_p10), 127   ;;  %vm571_vm0 = vcmask (!%p139_p10), 1046528  }
   0xf   : > { %142 = sbr.rel (%p139_p10) target bundleno = 863 (0x35f), region = 28  ;;  %2142 = vmatprep.subr.mxu0 (!%p139_p10), %v2331_v0  ;;  %2122 = vmatprep.subr.mxu1 (!%p139_p10), %v2331_v0  ;;  %v184_v2 = vunpack.c.l.s4 (!%p139_p10), %v2332_v1  ;;  %v2334_v10 = vmov (!%p139_p10), 1934713408   ;;  %s2335_s29 = smov (!%p139_p10), 8   ;;  %vm2342_vm1 = vmmov (!%p139_p10), 0   ;;  %vm277_vm2 = vcmask (!%p139_p10), 64512  }
  0x10   : > { %v187_v7 = vshrl.u32 (!%p139_p10), %v186_v3, 7  ;;  %v216_v11 = vunpack.c.l.s4 (!%p139_p10), %v2334_v10  ;;  %s2336_s30 = smov (!%p139_p10), 16   ;;  %s2337_s3 = smov (!%p139_p10), 24   ;;  %2144 = vmatprep.mubr.msk.f32.mxu0 (!%p139_p10), %vm2342_vm1, %v2331_v0  ;;  %2124 = vmatprep.mubr.msk.f32.mxu1 (!%p139_p10), %vm2342_vm1, %v2331_v0  ;;  %vm279_vm3 = vcmask (!%p139_p10), 130048   ;;  %vm281_vm4 = vcmask (!%p139_p10), 195584  }
  0x11   : > { %v185_v6 = vunpack.c.0.s8 (!%p139_p10), %v184_v2  ;;  %s2338_s4 = smov (!%p139_p10), 32   ;;  %s2339_s5 = smov (!%p139_p10), 40   ;;  %vm283_vm5 = vcmask (!%p139_p10), 261120   ;;  %vm285_vm6 = vcmask (!%p139_p10), 326656   ;;  %vm287_vm7 = vcmask (!%p139_p10), 392192  }
  0x12   : > { %v217_v23 = vunpack.c.0.s8 (!%p139_p10), %v216_v11  ;;  %s2340_s6 = smov (!%p139_p10), 48   ;;  %s2341_s7 = smov (!%p139_p10), 56   ;;  %vm289_vm8 = vcmask (!%p139_p10), 457728   ;;  %vm417_vm9 = vcmask (!%p139_p10), 1043456   ;;  %vm413_vm10 = vcmask (!%p139_p10), 31744  }
  0x13   : > { %v2443_v16 = vsub.s32 (!%p139_p10), %v185_v6, %v187_v7  ;;  %vm1933_vm11 = vcmask (!%p139_p10), 523264   ;;  %s161_s8 = sand.u32 (!%p139_p10), 1, %s2313_s10   ;;  %s2100_s16 = sshll.u32 (!%p139_p10), %s2321_s12, 7 }
  0x14   : > { %v2482_v40 = vsub.s32 (!%p139_p10), %v217_v23, %v187_v7  ;;  %s2054_s15 = sshll.u32 (!%p139_p10), %s161_s8, 3  ;;  %s2954_s25 = scalar_lea.hbm (!%p139_p10), %s3004_s2, %s2100_s16 }
  0x15   : > { %s163_s18 = scalar_lea.vmem (!%p139_p10), [#allocation2], %s2054_s15  ;;  %s1951_s26 = scalar_lea.sflag (!%p139_p10), [#allocation3], %s161_s8 }
  0x16   : > { %s165_s23 = scalar_select %p164_p11, %s2321_s12, 1 }
  0x17   : > { %s1965_s20 = sshll.u32 %s163_s18, 4  ;;  %s2343_s12 = smov [#allocation2]   ;;  %s2956_s20 = int_to_ptr.vmem [resolvable:$true] %s1965_s20 }
  0x18   : > { %s2103_s24 = sshll.u32 %s165_s23, 8 }
  0x19   : > { %s2421_s27 = scalar_lea.vmem %s3002_s0, %s2103_s24 }
  0x1a   : > { %v2424_v4 = vld [vmem:[%s2421_s27 + $0x20] sm:$0xff]  ;;  %v2434_v8 = vld [vmem:[%s2421_s27 + $0x30] sm:$0xff]  ;;  %v176_v12 = vld [vmem:[%s2421_s27 + $0x18] sm:$0x1] }
  0x1b   : > { %v2427_v5 = vld [vmem:[%s2421_s27] sm:$0xff]  ;;  %300 = vrot.lane.b32.xlu1 %v2424_v4, %s2333_s28  ;;  %v2437_v9 = vld [vmem:[%s2421_s27 + $0x10] sm:$0xff]  ;;  %v174_v13 = vld [vmem:[%s2421_s27 + $0x8] sm:$0x1]  ;;  %v576_v24 = vrot.slane %v176_v12, 1  ;;  %v581_v29 = vrot.slane %v2434_v8, 1 }
  0x1c   : > { %296 = vrot.lane.b32.xlu0 %v2427_v5, %s2333_s28  ;;  %v2068_v14 = vld [vmem:[%s2421_s27 + $0x40] sm:$0xff]  ;;  %v2070_v15 = vld [vmem:[%s2421_s27 + $0x50] sm:$0xff]  ;;  %v575_v21 = vrot.slane %v2437_v9, 1  ;;  %v572_v22 = vrot.slane %v2427_v5, 1  ;;  %v573_v25 = vrot.slane %v174_v13, 1  ;;  %v578_v35 = vrot.slane %v2424_v4, 1 }
  0x1d   : > { %v2072_v17 = vld [vmem:[%s2421_s27 + $0x60] sm:$0xff]  ;;  %v2074_v18 = vld [vmem:[%s2421_s27 + $0x70] sm:$0xff]  ;;  %v180_v26 = vld [vmem:[%s2421_s27 + $0x38] sm:$0x1]  ;;  %v1163_v45 = vrot.slane %v2068_v14, 1  ;;  %v1166_v49 = vrot.slane %v2070_v15, 1  ;;  %v181_v56 = vcombine.low %v2427_v5, %v2424_v4  ;;  %v197_v57 = vcombine.low %v2437_v9, %v2434_v8 }
  0x1e   : > { %v2452_v19 = vld [vmem:[%s2421_s27 + $0x90] sm:$0xff]  ;;  %v2455_v20 = vld [vmem:[%s2421_s27 + $0x80] sm:$0xff]  ;;  %v973_v27 = vcombine.low %v2068_v14, %v2072_v17  ;;  %v989_v28 = vcombine.low %v2070_v15, %v2074_v18  ;;  %v178_v30 = vld [vmem:[%s2421_s27 + $0x28] sm:$0x1]  ;;  %v582_v34 = vrot.slane %v180_v26, 1  ;;  %v2477_v38 = vsel %vm571_vm0, %v575_v21, %v576_v24 }
  0x1f   : > { %302 = vrot.lane.b32.xlu1 %v2434_v8, %s2333_s28  ;;  %v2468_v32 = vld [vmem:[%s2421_s27 + $0xb0] sm:$0xff]  ;;  %v2471_v33 = vld [vmem:[%s2421_s27 + $0xa0] sm:$0xff]  ;;  %v2069_v37 = vld [vmem:[%s2421_s27 + $0x48] sm:$0x1]  ;;  %v2480_v39 = vsel %vm571_vm0, %v572_v22, %v573_v25  ;;  %v579_v44 = vrot.slane %v178_v30, 1  ;;  %v974_v46 = vcombine.high %v2068_v14, %v2072_v17  ;;  %v990_v47 = vcombine.high %v2070_v15, %v2074_v18 }
  0x20   : > { %298 = vrot.lane.b32.xlu0 %v2437_v9, %s2333_s28  ;;  %v981_v31 = vrot.slane %v973_v27, %v2443_v16  ;;  %v997_v36 = vrot.slane %v989_v28, %v2443_v16  ;;  %v2071_v41 = vld [vmem:[%s2421_s27 + $0x58] sm:$0x1]  ;;  %v2073_v42 = vld [vmem:[%s2421_s27 + $0x68] sm:$0x1]  ;;  %v1169_v50 = vrot.slane %v2072_v17, 1  ;;  %v1172_v51 = vrot.slane %v2074_v18, 1 }
  0x21   : > { %v2075_v43 = vld [vmem:[%s2421_s27 + $0x78] sm:$0x1]  ;;  %v1164_v52 = vrot.slane %v2069_v37, 1  ;;  %v1167_v53 = vrot.slane %v2071_v41, 1  ;;  %v1170_v54 = vrot.slane %v2073_v42, 1  ;;  %v988_v59 = vrot.slane %v974_v46, %v2443_v16  ;;  %v2575_v46 = vld [vmem:[%s2421_s27 + $0xc0] sm:$0xff] }
  0x22   : > { %v1005_v48 = vcombine.low %v981_v31, %v997_v36  ;;  %v1173_v55 = vrot.slane %v2075_v43, 1  ;;  %v1006_v58 = vcombine.high %v981_v31, %v997_v36  ;;  %v1004_v60 = vrot.slane %v990_v47, %v2443_v16 }
  0x23   : > { %1554 = vrot.lane.b32.xlu1 %v2452_v19, %s2333_s28  ;;  %v2502_v61 = vsel %vm571_vm0, %v581_v29, %v582_v34  ;;  %v2505_v62 = vsel %vm571_vm0, %v578_v35, %v579_v44  ;;  %v2511_v1 = vsel %vm571_vm0, %v1163_v45, %v1164_v52  ;;  %v2514_v2 = vsel %vm571_vm0, %v1166_v49, %v1167_v53 }
  0x24   : > { %1552 = vrot.lane.b32.xlu0 %v2455_v20, %s2333_s28  ;;  %v2508_v63 = vrot.slane %v1005_v48, %v2482_v40  ;;  %v2517_v3 = vsel %vm571_vm0, %v1169_v50, %v1170_v54  ;;  %v2520_v6 = vsel %vm571_vm0, %v1172_v51, %v1173_v55  ;;  %v189_v7 = vrot.slane %v181_v56, %v2443_v16 }
  0x25   : > { %v1383_v10 = vcombine.high %v2452_v19, %v2468_v32  ;;  %v205_v11 = vrot.slane %v197_v57, %v2443_v16  ;;  %v1367_v12 = vcombine.high %v2455_v20, %v2471_v33  ;;  %v1020_v13 = vrot.slane %v1006_v58, %v2482_v40 }
  0x26   : > { %v1021_v14 = vcombine.low %v988_v59, %v1004_v60  ;;  %v1037_v15 = vcombine.high %v2508_v63, %v2331_v0  ;;  %v1179_v17 = vcombine.low %v2511_v1, %v2517_v3  ;;  %v1195_v18 = vcombine.low %v2514_v2, %v2520_v6 }
  0x27   : > { %1558 = vrot.lane.b32.xlu1 %v2468_v32, %s2333_s28  ;;  %v2540_v21 = vrot.slane %v1383_v10, %v2443_v16  ;;  %v2543_v22 = vrot.slane %v1367_v12, %v2443_v16  ;;  %v1038_v23 = vcombine.high %v1020_v13, %v2331_v0  ;;  %v1022_v25 = vcombine.high %v988_v59, %v1004_v60 }
  0x28   : > { %1556 = vrot.lane.b32.xlu0 %v2471_v33, %s2333_s28  ;;  %v1029_v24 = vrot.slane %v1021_v14, %v2482_v40  ;;  %v1187_v26 = vrot.slane %v1179_v17, %v2443_v16  ;;  %v1203_v27 = vrot.slane %v1195_v18, %v2443_v16  ;;  %v213_v28 = vcombine.low %v189_v7, %v205_v11 }
  0x29   : > { %v1036_v30 = vrot.slane %v1022_v25, %v2482_v40  ;;  %v1414_v35 = vcombine.low %v2543_v22, %v2540_v21  ;;  %v1415_v36 = vcombine.high %v2543_v22, %v2540_v21  ;;  %v182_v37 = vcombine.high %v2427_v5, %v2424_v4  ;;  %v2578_v4 = vld [vmem:[%s2421_s27 + $0xd0] sm:$0xff]  ;;  %v2581_v5 = vld [vmem:[%s2421_s27 + $0xe0] sm:$0xff] }
  0x2a   : > { %v1039_v29 = vcombine.high %v1029_v24, %v2331_v0  ;;  %v1211_v31 = vcombine.low %v1187_v26, %v1203_v27  ;;  %v2556_v34 = vrot.slane %v213_v28, %v2482_v40  ;;  %v198_v41 = vcombine.high %v2437_v9, %v2434_v8  ;;  %v2584_v8 = vld [vmem:[%s2421_s27 + $0xf0] sm:$0xff]  ;;  %s2251_s27 = scalar_lea.vmem %s2956_s20, 128 }
  0x2b   : > { %772 = vrot.lane.b32.xlu1 %v2477_v38, %s2333_s28  ;;  %v214_v42 = vcombine.high %v189_v7, %v205_v11  ;;  %v1040_v43 = vcombine.high %v1036_v30, %v2331_v0  ;;  %v1180_v9 = vcombine.high %v2511_v1, %v2517_v3  ;;  %v1752_v47 = vcombine.high %v2575_v46, %v2581_v5  ;;  %p2252_p12 = scmp.ne.s32.totalorder %s2956_s20, %s2251_s27 }
  0x2c   : > { %770 = vrot.lane.b32.xlu0 %v2480_v39, %s2333_s28  ;;  %v2570_v44 = vrot.slane %v1211_v31, %v2482_v40  ;;  %v245_v45 = vcombine.high %v2556_v34, %v2331_v0  ;;  %v1768_v48 = vcombine.high %v2578_v4, %v2584_v8  ;;  %v1212_v49 = vcombine.high %v1187_v26, %v1203_v27 }
  0x2d   : > { %v228_v50 = vrot.slane %v214_v42, %v2482_v40  ;;  %v1196_v51 = vcombine.high %v2514_v2, %v2520_v6  ;;  %v196_v52 = vrot.slane %v182_v37, %v2443_v16  ;;  %v212_v54 = vrot.slane %v198_v41, %v2443_v16  ;;  %p2253_p13 = pnand %p2252_p12, %p2399_p4 }
  0x2e   : > { %v1243_v53 = vcombine.high %v2570_v44, %v2331_v0  ;;  %v2602_v55 = vrot.slane %v1752_v47, %v2443_v16  ;;  %v2605_v56 = vrot.slane %v1768_v48, %v2443_v16  ;;  %v1194_v57 = vrot.slane %v1180_v9, %v2443_v16 }
  0x2f   : > { %776 = vrot.lane.b32.xlu1 %v2502_v61, %s2333_s28  ;;  %v1210_v58 = vrot.slane %v1196_v51, %v2443_v16  ;;  %v1226_v1 = vrot.slane %v1212_v49, %v2482_v40  ;;  %v246_v2 = vcombine.high %v228_v50, %v2331_v0  ;;  %v229_v3 = vcombine.low %v196_v52, %v212_v54  ;;  %p2254_p0 = pneg %p2253_p13 }
  0x30   : > { %774 = vrot.lane.b32.xlu0 %v2505_v62, %s2333_s28  ;;  %v1799_v59 = vcombine.low %v2602_v55, %v2605_v56  ;;  %v1800_v60 = vcombine.high %v2602_v55, %v2605_v56  ;;  %v604_v6 = vcombine.low %v2477_v38, %v2502_v61  ;;  %v588_v7 = vcombine.low %v2480_v39, %v2505_v62  ;;  %s2255_s28 = sshll.u32 %s2343_s12, 4  ;;  %s2256_s28 = int_to_ptr.vmem [resolvable:$false] %s2255_s28 }
  0x31   : > { %v1244_v10 = vcombine.high %v1226_v1, %v2331_v0  ;;  %v1227_v11 = vcombine.low %v1194_v57, %v1210_v58  ;;  %v237_v12 = vrot.slane %v229_v3, %v2482_v40  ;;  %v1366_v14 = vcombine.low %v2455_v20, %v2471_v33  ;;  %p2258_p1 = scmp.lt.s32.totalorder %s2956_s20, %s2256_s28 }
  0x32   : > { %v596_v17 = vrot.slane %v588_v7, %v2443_v16  ;;  %v605_v31 = vcombine.high %v2477_v38, %v2502_v61  ;;  %v589_v37 = vcombine.high %v2480_v39, %v2505_v62 }
  0x33   : > { %1046 = vrot.lane.b32.xlu1 %v1020_v13, %s2336_s30  ;;  %v1382_v13 = vcombine.low %v2452_v19, %v2468_v32  ;;  %v1235_v18 = vrot.slane %v1227_v11, %v2482_v40  ;;  %v1374_v19 = vrot.slane %v1366_v14, %v2443_v16  ;;  %v1228_v32 = vcombine.high %v1194_v57, %v1210_v58 }
  0x34   : > { %1042 = vrot.lane.b32.xlu0 %v1037_v15, %s2335_s29  ;;  %v612_v15 = vrot.slane %v604_v6, %v2443_v16  ;;  %v619_v9 = vrot.slane %v605_v31, %v2443_v16  ;;  %v603_v38 = vrot.slane %v589_v37, %v2443_v16  ;;  %v1767_v58 = vcombine.low %v2578_v4, %v2584_v8 }
  0x35   : > { %v1390_v25 = vrot.slane %v1382_v13, %v2443_v16  ;;  %v1245_v20 = vcombine.high %v1235_v18, %v2331_v0  ;;  %v1242_v28 = vrot.slane %v1228_v32, %v2482_v40 }
  0x36   : > { %v620_v26 = vcombine.low %v596_v17, %v612_v15  ;;  %v636_v49 = vcombine.low %v603_v38, %v619_v9 }
  0x37   : > { %1054 = vrot.lane.b32.xlu1 %v1029_v24, %s2338_s4  ;;  %v230_v24 = vcombine.high %v196_v52, %v212_v54  ;;  %v1398_v27 = vcombine.low %v1374_v19, %v1390_v25  ;;  %v1246_v42 = vcombine.high %v1242_v28, %v2331_v0  ;;  %v1399_v61 = vcombine.high %v1374_v19, %v1390_v25 }
  0x38   : > { %1050 = vrot.lane.b32.xlu0 %v1038_v23, %s2337_s3  ;;  %v247_v23 = vcombine.high %v237_v12, %v2331_v0  ;;  %v644_v51 = vrot.slane %v636_v49, %v2482_v40  ;;  %v637_v52 = vcombine.high %v603_v38, %v619_v9  ;;  %v1422_v54 = vrot.slane %v1414_v35, %v2482_v40 }
  0x39   : > { %v244_v33 = vrot.slane %v230_v24, %v2482_v40  ;;  %v2657_v41 = vrot.slane %v1398_v27, %v2482_v40  ;;  %v1413_v47 = vrot.slane %v1399_v61, %v2482_v40  ;;  %v1429_v35 = vrot.slane %v1415_v36, %v2482_v40 }
  0x3a   : > { %v654_v57 = vcombine.high %v644_v51, %v2331_v0 }
  0x3b   : > { %1062 = vrot.lane.b32.xlu1 %v1036_v30, %s2340_s6  ;;  %v2650_v30 = vrot.slane %v620_v26, %v2482_v40  ;;  %v1430_v39 = vcombine.high %v2657_v41, %v2331_v0  ;;  %v1433_v3 = vcombine.high %v1429_v35, %v2331_v0 }
  0x3c   : > { %1058 = vrot.lane.b32.xlu0 %v1039_v29, %s2339_s5  ;;  %v248_v29 = vcombine.high %v244_v33, %v2331_v0 }
  0x3f   : > { %250 = vrot.lane.b32.xlu1 %v245_v45, %s2335_s29  ;;  %v621_v45 = vcombine.high %v596_v17, %v612_v15 }
  0x40   : > { %1066 = vrot.lane.b32.xlu0 %v1040_v43, %s2341_s7  ;;  %v652_v43 = vcombine.high %v2650_v30, %v2331_v0 }
  0x41   : > { %v635_v62 = vrot.slane %v621_v45, %v2482_v40 }
  0x43   : > { %254 = vrot.lane.b32.xlu1 %v228_v50, %s2336_s30  ;;  %v653_v48 = vcombine.high %v635_v62, %v2331_v0  ;;  %v1431_v50 = vcombine.high %v1413_v47, %v2331_v0 }
  0x44   : > { %1248 = vrot.lane.b32.xlu0 %v1243_v53, %s2335_s29  ;;  %v1751_v53 = vcombine.low %v2575_v46, %v2581_v5  ;;  %v1432_v46 = vcombine.high %v1422_v54, %v2331_v0 }
  0x46   : > { %v1759_v5 = vrot.slane %v1751_v53, %v2443_v16 }
  0x47   : > { %258 = vrot.lane.b32.xlu1 %v246_v2, %s2337_s3  ;;  %v1775_v2 = vrot.slane %v1767_v58, %v2443_v16 }
  0x48   : > { %1252 = vrot.lane.b32.xlu0 %v1226_v1, %s2336_s30  ;;  %v651_v1 = vrot.slane %v637_v52, %v2482_v40 }
  0x49   : > { %v1783_v8 = vcombine.low %v1759_v5, %v1775_v2  ;;  %v1784_v22 = vcombine.high %v1759_v5, %v1775_v2 }
  0x4a   : > { %v655_v4 = vcombine.high %v651_v1, %v2331_v0 }
  0x4b   : > { %262 = vrot.lane.b32.xlu1 %v237_v12, %s2338_s4  ;;  %v2707_v6 = vrot.slane %v1783_v8, %v2482_v40  ;;  %v1798_v36 = vrot.slane %v1784_v22, %v2482_v40 }
  0x4c   : > { %1256 = vrot.lane.b32.xlu0 %v1244_v10, %s2337_s3 }
  0x4d   : > { %v1815_v21 = vcombine.high %v2707_v6, %v2331_v0  ;;  %v1816_v7 = vcombine.high %v1798_v36, %v2331_v0 }
  0x4f   : > { %266 = vrot.lane.b32.xlu1 %v247_v23, %s2339_s5 }
  0x50   : > { %1260 = vrot.lane.b32.xlu0 %v1235_v18, %s2338_s4 }
  0x53   : > { %270 = vrot.lane.b32.xlu1 %v244_v33, %s2340_s6 }
  0x54   : > { %1264 = vrot.lane.b32.xlu0 %v1245_v20, %s2339_s5 }
  0x57   : > { %274 = vrot.lane.b32.xlu1 %v248_v29, %s2341_s7 }
  0x58   : > { %1268 = vrot.lane.b32.xlu0 %v1242_v28, %s2340_s6 }
  0x5b   : > { %657 = vrot.lane.b32.xlu1 %v652_v43, %s2335_s29 }
  0x5c   : > { %1272 = vrot.lane.b32.xlu0 %v1246_v42, %s2341_s7 }
  0x5f   : > { %661 = vrot.lane.b32.xlu1 %v635_v62, %s2336_s30 }
  0x60   : > { %1435 = vrot.lane.b32.xlu0 %v1430_v39, %s2335_s29 }
  0x63   : > { %665 = vrot.lane.b32.xlu1 %v653_v48, %s2337_s3 }
  0x64   : > { %1439 = vrot.lane.b32.xlu0 %v1413_v47, %s2336_s30 }
  0x67   : > { %669 = vrot.lane.b32.xlu1 %v644_v51, %s2338_s4 }
  0x68   : > { %1443 = vrot.lane.b32.xlu0 %v1431_v50, %s2337_s3 }
  0x6b   : > { %673 = vrot.lane.b32.xlu1 %v654_v57, %s2339_s5 }
  0x6c   : > { %1447 = vrot.lane.b32.xlu0 %v1422_v54, %s2338_s4 }
  0x6f   : > { %677 = vrot.lane.b32.xlu1 %v651_v1, %s2340_s6 }
  0x70   : > { %1451 = vrot.lane.b32.xlu0 %v1432_v46, %s2339_s5 }
  0x73   : > { %681 = vrot.lane.b32.xlu1 %v655_v4, %s2341_s7 }
  0x74   : > { %1455 = vrot.lane.b32.xlu0 %v1429_v35, %s2340_s6 }
  0x78   : > { %1459 = vrot.lane.b32.xlu0 %v1433_v3, %s2341_s7 }
  0x7c   : > { %1820 = vrot.lane.b32.xlu0 %v1815_v21, %s2335_s29 }
  0x80   : > { %1824 = vrot.lane.b32.xlu0 %v1798_v36, %s2336_s30 }
  0x84   : > { %1828 = vrot.lane.b32.xlu0 %v1816_v7, %s2337_s3 }
  0x8d   : > { %v301_v10 = vpop.permute.xlu1 %300 }
  0x8e   : > { %v297_v11 = vpop.permute.xlu0 %296 }
  0x8f   : > { %v308_v12 = vcombine.low %v297_v11, %v301_v10  ;;  %v309_v13 = vcombine.high %v297_v11, %v301_v10 }
  0x91   : > { %v303_v14 = vpop.permute.xlu1 %302  ;;  %v316_v23 = vrot.slane %v308_v12, %v2443_v16  ;;  %v323_v19 = vrot.slane %v309_v13, %v2443_v16 }
  0x92   : > { %v299_v15 = vpop.permute.xlu0 %298 }
  0x93   : > { %v324_v17 = vcombine.low %v299_v15, %v303_v14  ;;  %v325_v18 = vcombine.high %v299_v15, %v303_v14 }
  0x95   : > { %v332_v24 = vrot.slane %v324_v17, %v2443_v16  ;;  %v339_v25 = vrot.slane %v325_v18, %v2443_v16  ;;  %v1555_v32 = vpop.permute.xlu1 %1554 }
  0x96   : > { %v1553_v20 = vpop.permute.xlu0 %1552 }
  0x97   : > { %v341_v33 = vcombine.high %v316_v23, %v332_v24  ;;  %v356_v26 = vcombine.low %v323_v19, %v339_v25  ;;  %v340_v45 = vcombine.low %v316_v23, %v332_v24  ;;  %v357_v9 = vcombine.high %v323_v19, %v339_v25 }
  0x99   : > { %v355_v27 = vrot.slane %v341_v33, %v2482_v40  ;;  %v1559_v28 = vpop.permute.xlu1 %1558  ;;  %v364_v38 = vrot.slane %v356_v26, %v2482_v40  ;;  %v371_v53 = vrot.slane %v357_v9, %v2482_v40  ;;  %v2732_v54 = vrot.slane %v340_v45, %v2482_v40 }
  0x9a   : > { %v1557_v29 = vpop.permute.xlu0 %1556  ;;  %v1580_v31 = vcombine.low %v1555_v32, %v1559_v28  ;;  %v1581_v37 = vcombine.high %v1555_v32, %v1559_v28 }
  0x9b   : > { %v1564_v42 = vcombine.low %v1553_v20, %v1557_v29  ;;  %v1565_v43 = vcombine.high %v1553_v20, %v1557_v29  ;;  %381 = vrot.lane.b32.xlu1 %v355_v27, %s2336_s30  ;;  %v372_v2 = vcombine.high %v2732_v54, %v2331_v0  ;;  %v373_v3 = vcombine.high %v355_v27, %v2331_v0 }
  0x9c   : > { %v1588_v39 = vrot.slane %v1580_v31, %v2443_v16  ;;  %v1595_v61 = vrot.slane %v1581_v37, %v2443_v16  ;;  %v374_v14 = vcombine.high %v364_v38, %v2331_v0  ;;  %v375_v20 = vcombine.high %v371_v53, %v2331_v0 }
  0x9d   : > { %v1572_v62 = vrot.slane %v1564_v42, %v2443_v16  ;;  %v1579_v47 = vrot.slane %v1565_v43, %v2443_v16  ;;  %v773_v48 = vpop.permute.xlu1 %772  ;;  %v2076_v42 = vld [vmem:[%s3003_s1 + $0x8] sm:$0xff] }
  0x9e   : > { %v771_v49 = vpop.permute.xlu0 %770 }
  0x9f   : > { %v1597_v50 = vcombine.high %v1572_v62, %v1588_v39  ;;  %389 = vrot.lane.b32.xlu1 %v364_v38, %s2338_s4  ;;  %v1612_v51 = vcombine.low %v1579_v47, %v1595_v61  ;;  %v1596_v1 = vcombine.low %v1572_v62, %v1588_v39  ;;  %v1613_v46 = vcombine.high %v1579_v47, %v1595_v61 }
  0xa1   : > { %v1611_v52 = vrot.slane %v1597_v50, %v2482_v40  ;;  %v777_v57 = vpop.permute.xlu1 %776  ;;  %v1620_v5 = vrot.slane %v1612_v51, %v2482_v40  ;;  %v1627_v7 = vrot.slane %v1613_v46, %v2482_v40  ;;  %v2747_v10 = vrot.slane %v1596_v1, %v2482_v40 }
  0xa2   : > { %v775_v58 = vpop.permute.xlu0 %774  ;;  %v798_v22 = vcombine.low %v773_v48, %v777_v57  ;;  %v799_v13 = vcombine.high %v773_v48, %v777_v57 }
  0xa3   : > { %1637 = vrot.lane.b32.xlu0 %v1611_v52, %s2336_s30  ;;  %397 = vrot.lane.b32.xlu1 %v371_v53, %s2340_s6  ;;  %v782_v36 = vcombine.low %v771_v49, %v775_v58  ;;  %v783_v18 = vcombine.high %v771_v49, %v775_v58  ;;  %v1628_v24 = vcombine.high %v2747_v10, %v2331_v0 }
  0xa4   : > { %v806_v17 = vrot.slane %v798_v22, %v2443_v16  ;;  %v813_v26 = vrot.slane %v799_v13, %v2443_v16  ;;  %v1629_v29 = vcombine.high %v1611_v52, %v2331_v0  ;;  %v1630_v45 = vcombine.high %v1620_v5, %v2331_v0 }
  0xa5   : > { %v1047_v4 = vpop.permute.xlu1 %1046  ;;  %v790_v23 = vrot.slane %v782_v36, %v2443_v16  ;;  %v797_v27 = vrot.slane %v783_v18, %v2443_v16  ;;  %v1631_v47 = vcombine.high %v1627_v7, %v2331_v0  ;;  %v1807_v52 = vrot.slane %v1799_v59, %v2482_v40 }
  0xa6   : > { %v1043_v35 = vpop.permute.xlu0 %1042 }
  0xa7   : > { %1645 = vrot.lane.b32.xlu0 %v1620_v5, %s2338_s4  ;;  %377 = vrot.lane.b32.xlu1 %v372_v2, %s2335_s29  ;;  %v1069_v8 = vsel %vm277_vm2, %v2508_v63, %v1043_v35  ;;  %v815_v28 = vcombine.high %v790_v23, %v806_v17  ;;  %v814_v9 = vcombine.low %v790_v23, %v806_v17 }
  0xa8   : > { %v1070_v21 = vsel %vm279_vm3, %v1069_v8, %v1047_v4  ;;  %v830_v38 = vcombine.low %v797_v27, %v813_v26  ;;  %v1817_v5 = vcombine.high %v1807_v52, %v2331_v0  ;;  %v831_v22 = vcombine.high %v797_v27, %v813_v26 }
  0xa9   : > { %v1055_v12 = vpop.permute.xlu1 %1054  ;;  %v829_v39 = vrot.slane %v815_v28, %v2482_v40  ;;  %v2787_v49 = vrot.slane %v814_v9, %v2482_v40 }
  0xaa   : > { %v1051_v11 = vpop.permute.xlu0 %1050  ;;  %v838_v48 = vrot.slane %v830_v38, %v2482_v40  ;;  %v845_v55 = vrot.slane %v831_v22, %v2482_v40 }
  0xab   : > { %1653 = vrot.lane.b32.xlu0 %v1627_v7, %s2340_s6  ;;  %385 = vrot.lane.b32.xlu1 %v373_v3, %s2337_s3  ;;  %v1071_v63 = vsel %vm281_vm4, %v1070_v21, %v1051_v11  ;;  %v846_v57 = vcombine.high %v2787_v49, %v2331_v0  ;;  %v847_v35 = vcombine.high %v829_v39, %v2331_v0 }
  0xac   : > { %v1072_v15 = vsel %vm283_vm5, %v1071_v63, %v1055_v12  ;;  %v848_v36 = vcombine.high %v838_v48, %v2331_v0  ;;  %v849_v13 = vcombine.high %v845_v55, %v2331_v0 }
  0xad   : > { %v1063_v19 = vpop.permute.xlu1 %1062 }
  0xae   : > { %v1059_v25 = vpop.permute.xlu0 %1058 }
  0xaf   : > { %1633 = vrot.lane.b32.xlu0 %v1628_v24, %s2335_s29  ;;  %393 = vrot.lane.b32.xlu1 %v374_v14, %s2339_s5  ;;  %v1073_v32 = vsel %vm285_vm6, %v1072_v15, %v1059_v25  ;;  %v2079_v15 = vld [vmem:[%s3003_s1 + $0x38] sm:$0xff] }
  0xb0   : > { %v1074_v33 = vsel %vm287_vm7, %v1073_v32, %v1063_v19 }
  0xb1   : > { %v251_v37 = vpop.permute.xlu1 %250 }
  0xb2   : > { %v1067_v31 = vpop.permute.xlu0 %1066  ;;  %v278_v16 = vsel %vm277_vm2, %v2556_v34, %v251_v37 }
  0xb3   : > { %1641 = vrot.lane.b32.xlu0 %v1629_v29, %s2337_s3  ;;  %401 = vrot.lane.b32.xlu1 %v375_v20, %s2341_s7  ;;  %v1075_v43 = vsel %vm289_vm8, %v1074_v33, %v1067_v31 }
  0xb4   : > { %2143 = vmatpush3.msk.msra.mxu0 %vm417_vm9, %v1075_v43 }
  0xb5   : > { %2147 = vmatprep.subr.mxu0 %v2331_v0  ;;  %2145 = vmatmul.mubr.msk.f32.vlgmr.msra.gmra.mrb[0].mxu0 %vm413_vm10, %v2076_v42  ;;  %v255_v62 = vpop.permute.xlu1 %254 }
  0xb6   : > { %v1249_v61 = vpop.permute.xlu0 %1248  ;;  %2149 = vmatprep.mubr.msk.f32.mxu0 %vm2342_vm1, %v2331_v0  ;;  %v280_v34 = vsel %vm279_vm3, %v278_v16, %v255_v62 }
  0xb7   : > { %1649 = vrot.lane.b32.xlu0 %v1630_v45, %s2339_s5  ;;  %855 = vrot.lane.b32.xlu1 %v829_v39, %s2336_s30  ;;  %v1275_v58 = vsel %vm277_vm2, %v2570_v44, %v1249_v61  ;;  %v1814_v44 = vrot.slane %v1800_v60, %v2482_v40 }
  0xb9   : > { %v259_v51 = vpop.permute.xlu1 %258  ;;  %v1818_v12 = vcombine.high %v1814_v44, %v2331_v0 }
  0xba   : > { %v1253_v50 = vpop.permute.xlu0 %1252  ;;  %v282_v53 = vsel %vm281_vm4, %v280_v34, %v259_v51 }
  0xbb   : > { %1657 = vrot.lane.b32.xlu0 %v1631_v47, %s2341_s7  ;;  %863 = vrot.lane.b32.xlu1 %v838_v48, %s2338_s4  ;;  %v1276_v59 = vsel %vm279_vm3, %v1275_v58, %v1253_v50 }
  0xbd   : > { %v263_v46 = vpop.permute.xlu1 %262 }
  0xbe   : > { %v1257_v1 = vpop.permute.xlu0 %1256  ;;  %v284_v2 = vsel %vm283_vm5, %v282_v53, %v263_v46 }
  0xbf   : > { %1832 = vrot.lane.b32.xlu0 %v1807_v52, %s2338_s4  ;;  %851 = vrot.lane.b32.xlu1 %v846_v57, %s2335_s29  ;;  %v1277_v3 = vsel %vm281_vm4, %v1276_v59, %v1257_v1  ;;  %s2257_s29 = scalar_lea.vmem %s2256_s28, 256 }
  0xc0   : > { %p2259_p2 = scmp.lt.s32.totalorder %s2257_s29, %s2251_s27 }
  0xc1   : > { %v267_v8 = vpop.permute.xlu1 %266 }
  0xc2   : > { %v1261_v4 = vpop.permute.xlu0 %1260  ;;  %v2814_v21 = vsel %vm285_vm6, %v284_v2, %v267_v8  ;;  %p2260_p3 = por %p2259_p2, %p2258_p1 }
  0xc3   : > { %1836 = vrot.lane.b32.xlu0 %v1817_v5, %s2339_s5  ;;  %859 = vrot.lane.b32.xlu1 %v847_v35, %s2337_s3  ;;  %v1278_v7 = vsel %vm283_vm5, %v1277_v3, %v1261_v4 }
  0xc4   : > { %p2261_p5 = pnand %p2260_p3, %p2254_p0 }
  0xc5   : > { %v271_v23 = vpop.permute.xlu1 %270 }
  0xc6   : > { %v1265_v11 = vpop.permute.xlu0 %1264 }
  0xc7   : > { %1840 = vrot.lane.b32.xlu0 %v1814_v44, %s2340_s6  ;;  %867 = vrot.lane.b32.xlu1 %v848_v36, %s2339_s5  ;;  %v1279_v56 = vsel %vm285_vm6, %v1278_v7, %v1265_v11  ;;  %v288_v36 = vsel %vm287_vm7, %v2814_v21, %v271_v23 }
  0xc9   : > { %v275_v20 = vpop.permute.xlu1 %274 }
  0xca   : > { %v1269_v60 = vpop.permute.xlu0 %1268  ;;  %v290_v21 = vsel %vm289_vm8, %v288_v36, %v275_v20 }
  0xcb   : > { %1844 = vrot.lane.b32.xlu0 %v1818_v12, %s2341_s7  ;;  %871 = vrot.lane.b32.xlu1 %v845_v55, %s2340_s6  ;;  %v1280_v63 = vsel %vm287_vm7, %v1279_v56, %v1269_v60  ;;  %v2057_v55 = vld [vmem:[%s3003_s1 + $0x10] sm:$0xff] }
  0xcd   : > { %v658_v28 = vpop.permute.xlu1 %657 }
  0xce   : > { %v1273_v14 = vpop.permute.xlu0 %1272  ;;  %v684_v2 = vsel %vm277_vm2, %v2650_v30, %v658_v28 }
  0xcf   : > { %875 = vrot.lane.b32.xlu1 %v849_v13, %s2341_s7  ;;  %v1281_v40 = vsel %vm289_vm8, %v1280_v63, %v1273_v14 }
  0xd0   : > { %2148 = vmatpush3.msk.msra.mxu0 %vm417_vm9, %v1281_v40 }
  0xd1   : > { %2152 = vmatprep.subr.mxu0 %v2331_v0  ;;  %2150 = vmatmul.mubr.msk.f32.vlgmr.msra.gmra.mrb[0].mxu0 %vm413_vm10, %v2079_v15  ;;  %v662_v43 = vpop.permute.xlu1 %661 }
  0xd2   : > { %v1436_v17 = vpop.permute.xlu0 %1435  ;;  %2154 = vmatprep.mubr.msk.f32.mxu0 %vm2342_vm1, %v2331_v0  ;;  %v685_v35 = vsel %vm279_vm3, %v684_v2, %v662_v43 }
  0xd3   : > { %v1462_v24 = vsel %vm277_vm2, %v2657_v41, %v1436_v17  ;;  %v2086_v41 = vld [vmem:[%s3003_s1 + $0x18] sm:$0xff] }
  0xd5   : > { %v666_v16 = vpop.permute.xlu1 %665 }
  0xd6   : > { %v1440_v18 = vpop.permute.xlu0 %1439  ;;  %v686_v22 = vsel %vm281_vm4, %v685_v35, %v666_v16 }
  0xd7   : > { %v1463_v19 = vsel %vm279_vm3, %v1462_v24, %v1440_v18 }
  0xd9   : > { %v670_v9 = vpop.permute.xlu1 %669 }
  0xda   : > { %v1444_v25 = vpop.permute.xlu0 %1443  ;;  %v687_v60 = vsel %vm283_vm5, %v686_v22, %v670_v9 }
  0xdb   : > { %v1464_v33 = vsel %vm281_vm4, %v1463_v19, %v1444_v25  ;;  %v291_v25 = vld [vmem:[%s3003_s1] sm:$0xff]  ;;  %v2089_v19 = vld [vmem:[%s3003_s1 + $0x28] sm:$0xff] }
  0xdd   : > { %v674_v38 = vpop.permute.xlu1 %673 }
  0xde   : > { %v1448_v32 = vpop.permute.xlu0 %1447  ;;  %v688_v15 = vsel %vm285_vm6, %v687_v60, %v674_v38 }
  0xdf   : > { %v1465_v26 = vsel %vm283_vm5, %v1464_v33, %v1448_v32 }
  0xe1   : > { %v678_v39 = vpop.permute.xlu1 %677 }
  0xe2   : > { %v1452_v27 = vpop.permute.xlu0 %1451  ;;  %v689_v17 = vsel %vm287_vm7, %v688_v15, %v678_v39 }
  0xe3   : > { %v1466_v29 = vsel %vm285_vm6, %v1465_v26, %v1452_v27 }
  0xe5   : > { %v682_v62 = vpop.permute.xlu1 %681 }
  0xe6   : > { %v1456_v31 = vpop.permute.xlu0 %1455  ;;  %v690_v20 = vsel %vm289_vm8, %v689_v17, %v682_v62  ;;  %v2096_v62 = vld [vmem:[%s3003_s1 + $0x20] sm:$0xff] }
  0xe7   : > { %v1467_v37 = vsel %vm287_vm7, %v1466_v29, %v1456_v31  ;;  %v2062_v31 = vld [vmem:[%s3003_s1 + $0x30] sm:$0xff] }
  0xea   : > { %v1460_v42 = vpop.permute.xlu0 %1459 }
  0xeb   : > { %v1468_v45 = vsel %vm289_vm8, %v1467_v37, %v1460_v42 }
  0xec   : > { %2153 = vmatpush3.msk.msra.mxu0 %vm417_vm9, %v1468_v45 }
  0xed   : > { %2157 = vmatprep.subr.mxu0 %v2331_v0  ;;  %2155 = vmatmul.mubr.msk.f32.vlgmr.msra.gmra.mrb[0].mxu0 %vm413_vm10, %v2086_v41 }
  0xee   : > { %2159 = vmatprep.mubr.msk.f32.mxu0 %vm2342_vm1, %v2331_v0  ;;  %v2853_v61 = vpop.permute.xlu0 %1820 }
  0xef   : > { %v1847_v27 = vsel %vm277_vm2, %v2707_v6, %v2853_v61 }
  0xf2   : > { %v2855_v34 = vpop.permute.xlu0 %1824 }
  0xf3   : > { %v1848_v37 = vsel %vm279_vm3, %v1847_v27, %v2855_v34 }
  0xf6   : > { %v2857_v48 = vpop.permute.xlu0 %1828 }
  0xf7   : > { %v1849_v6 = vsel %vm281_vm4, %v1848_v37, %v2857_v48 }
 0x10d   : > { %v382_v47 = vpop.permute.xlu1 %381 }
 0x111   : > { %v390_v50 = vpop.permute.xlu1 %389 }
 0x115   : > { %v1638_v51 = vpop.permute.xlu0 %1637  ;;  %v398_v52 = vpop.permute.xlu1 %397 }
 0x119   : > { %v1646_v53 = vpop.permute.xlu0 %1645  ;;  %v378_v57 = vpop.permute.xlu1 %377 }
 0x11a   : > { %v404_v58 = vsel %vm277_vm2, %v2732_v54, %v378_v57 }
 0x11b   : > { %v405_v46 = vsel %vm279_vm3, %v404_v58, %v382_v47 }
 0x11d   : > { %v1654_v1 = vpop.permute.xlu0 %1653  ;;  %v386_v5 = vpop.permute.xlu1 %385 }
 0x11e   : > { %v406_v59 = vsel %vm281_vm4, %v405_v46, %v386_v5 }
 0x11f   : > { %v407_v8 = vsel %vm283_vm5, %v406_v59, %v390_v50 }
 0x121   : > { %v1634_v4 = vpop.permute.xlu0 %1633  ;;  %v394_v44 = vpop.permute.xlu1 %393 }
 0x122   : > { %v1660_v3 = vsel %vm277_vm2, %v2747_v10, %v1634_v4  ;;  %v408_v54 = vsel %vm285_vm6, %v407_v8, %v394_v44 }
 0x123   : > { %v1661_v30 = vsel %vm279_vm3, %v1660_v3, %v1638_v51  ;;  %v409_v12 = vsel %vm287_vm7, %v408_v54, %v398_v52  ;;  %v2065_v51 = vld [vmem:[%s3003_s1 + $0x40] sm:$0xff] }
 0x125   : > { %v1642_v7 = vpop.permute.xlu0 %1641  ;;  %v402_v11 = vpop.permute.xlu1 %401 }
 0x126   : > { %v1662_v56 = vsel %vm281_vm4, %v1661_v30, %v1642_v7  ;;  %v410_v10 = vsel %vm289_vm8, %v409_v12, %v402_v11 }
 0x127   : > { %2123 = vmatpush3.msk.msra.mxu1 %vm417_vm9, %v410_v10  ;;  %v1663_v63 = vsel %vm283_vm5, %v1662_v56, %v1646_v53 }
 0x128   : > { %2125 = vmatmul.mubr.msk.f32.vlgmr.msra.gmra.mrb[0].mxu1 %vm413_vm10, %v2057_v55  ;;  %2127 = vmatprep.subr.mxu1 %v2331_v0 }
 0x129   : > { %v1650_v13 = vpop.permute.xlu0 %1649  ;;  %2128 = vmatpush3.msk.msra.mxu1 %vm417_vm9, %v290_v21  ;;  %v856_v14 = vpop.permute.xlu1 %855  ;;  %2129 = vmatprep.mubr.msk.f32.mxu1 %vm2342_vm1, %v2331_v0 }
 0x12a   : > { %v1664_v40 = vsel %vm285_vm6, %v1663_v63, %v1650_v13  ;;  %2132 = vmatprep.subr.mxu1 %v2331_v0 }
 0x12b   : > { %v1665_v18 = vsel %vm287_vm7, %v1664_v40, %v1654_v1 }
 0x12d   : > { %v1658_v23 = vpop.permute.xlu0 %1657  ;;  %v864_v24 = vpop.permute.xlu1 %863 }
 0x12e   : > { %v1666_v32 = vsel %vm289_vm8, %v1665_v18, %v1658_v23 }
 0x12f   : > { %2158 = vmatpush3.msk.msra.mxu0 %vm417_vm9, %v1666_v32 }
 0x130   : > { %2130 = vmatmul.mubr.msk.f32.vlgmr.msra.gmra.mrb[0].mxu1 %vm413_vm10, %v291_v25  ;;  %2160 = vmatmul.mubr.msk.f32.vlgmr.msra.gmra.mrb[0].mxu0 %vm413_vm10, %v2089_v19 }
 0x131   : > { %2133 = vmatpush3.msk.msra.mxu1 %vm417_vm9, %v690_v20  ;;  %v1833_v33 = vpop.permute.xlu0 %1832  ;;  %v852_v26 = vpop.permute.xlu1 %851  ;;  %2134 = vmatprep.mubr.msk.f32.mxu1 %vm2342_vm1, %v2331_v0 }
 0x132   : > { %2162 = vmatprep.subr.mxu0 %v2331_v0  ;;  %2164 = vmatprep.mubr.msk.f32.mxu0 %vm2342_vm1, %v2331_v0  ;;  %v878_v42 = vsel %vm277_vm2, %v2787_v49, %v852_v26  ;;  %v1850_v45 = vsel %vm283_vm5, %v1849_v6, %v1833_v33 }
 0x133   : > { %2137 = vmatprep.subr.mxu1 %v2331_v0  ;;  %v879_v16 = vsel %vm279_vm3, %v878_v42, %v856_v14 }
 0x135   : > { %v1837_v28 = vpop.permute.xlu0 %1836  ;;  %v860_v29 = vpop.permute.xlu1 %859 }
 0x136   : > { %v1851_v9 = vsel %vm285_vm6, %v1850_v45, %v1837_v28  ;;  %v880_v38 = vsel %vm281_vm4, %v879_v16, %v860_v29 }
 0x137   : > { %v881_v34 = vsel %vm283_vm5, %v880_v38, %v864_v24 }
 0x138   : > { %2135 = vmatmul.mubr.msk.f32.vlgmr.msra.gmra.mrb[0].mxu1 %vm413_vm10, %v2062_v31 }
 0x139   : > { %v1841_v41 = vpop.permute.xlu0 %1840  ;;  %v868_v43 = vpop.permute.xlu1 %867  ;;  %2139 = vmatprep.mubr.msk.f32.mxu1 %vm2342_vm1, %v2331_v0 }
 0x13a   : > { %v1852_v49 = vsel %vm287_vm7, %v1851_v9, %v1841_v41  ;;  %v882_v47 = vsel %vm285_vm6, %v881_v34, %v868_v43 }
 0x13d   : > { %v1845_v39 = vpop.permute.xlu0 %1844  ;;  %v872_v61 = vpop.permute.xlu1 %871 }
 0x13e   : > { %v1853_v0 = vsel %vm289_vm8, %v1852_v49, %v1845_v39  ;;  %v883_v48 = vsel %vm287_vm7, %v882_v47, %v872_v61 }
 0x13f   : > { %2163 = vmatpush3.msk.msra.mxu0 %vm417_vm9, %v1853_v0 }
 0x140   : > { %2165 = vmatmul.mubr.msk.f32.vlgmr.msra.gmra.mrb[0].mxu0 %vm413_vm10, %v2096_v62 }
 0x141   : > { %v876_v50 = vpop.permute.xlu1 %875 }
 0x142   : > { %v884_v52 = vsel %vm289_vm8, %v883_v48, %v876_v50 }
 0x143   : > { %2138 = vmatpush3.msk.msra.mxu1 %vm417_vm9, %v884_v52 }
 0x144   : > { %2140 = vmatmul.mubr.msk.f32.vlgmr.msra.gmra.mrb[0].mxu1 %vm413_vm10, %v2065_v51 }
 0x213   : > { %v1928_v53 = vpop.f32.mrb[0].mxu0 }
 0x214   : > { %v2166_v57 = vpop.f32.mrb[1].mxu0 }
 0x217   : > { %v959_v58 = vpop.f32.mrb[0].mxu1 }
 0x218   : > { %v2167_v1 = vadd.f32 %v1928_v53, %v959_v58  ;;  %v2141_v46 = vpop.f32.mrb[1].mxu1 }
 0x21a   : > { %v1934_v5 = vsel %vm1933_vm11, %v2167_v1, 0.0 }
 0x21b   : > { %1935 = vadd.xlane.f32.xlu1 %v1934_v5 }
 0x2a8   : > { %v1936_v2 = vpop.xlane.xlu1 %1935 }
 0x2a9   : > { %v1938_v59 = vmul.f32 0.015625, %v1936_v2 }
 0x2ab   : > { %v1939_v35 = vsub.f32 %v2167_v1, %v1938_v59 }
 0x2ad   : > { %v1940_v4 = vmul.f32 %v1939_v35, %v1939_v35 }
 0x2af   : > { %v1941_v8 = vsel %vm1933_vm11, %v1940_v4, 0.0 }
 0x2b0   : > { %1942 = vadd.xlane.f32.xlu0 %v1941_v8 }
 0x33d   : > { %v1943_v44 = vpop.xlane.xlu0 %1942 }
 0x33e   : > { %v1944_v3 = vmul.f32 0.015625, %v1943_v44 }
 0x340   : > { %v1945_v54 = vadd.f32 1e-05, %v1944_v3 }
 0x342   : > { %2249 = vrsqrt.f32 %v1945_v54 }
 0x34c   : > { %v2250_v22 = vpop.eup %2249 }
 0x34d   : > { %v1947_v36 = vmul.f32 %v2250_v22, %v1939_v35 }
 0x34f   : > { %v1948_v30 = vmax.f32 %v1947_v36, 0.0 }
 0x351   : > { %1949 = vst.msk [vmem:[%s163_s18] sm:$0xff] %vm1933_vm11, %v1948_v30 }
 0x352   : > { %2264 = shalt.err (!%p2261_p5)
}
 0x353   : > { %s2265_s30 = scalar_lea.hbm %s2954_s25, 128  ;;  %s2269_s5 = scalar_lea.hbm %s3004_s2, 256 }
 0x354   : > { %p2266_p6 = scmp.ne.s32.totalorder %s2954_s25, %s2265_s30  ;;  %p2270_p10 = scmp.lt.u32.totalorder %s2954_s25, %s3004_s2 }
 0x355   : > { %p2271_p11 = scmp.lt.u32.totalorder %s2269_s5, %s2265_s30  ;;  %p2273_p13 = scmp.lt.u32.totalorder %s2265_s30, %s2954_s25 }
 0x356   : > { %p2267_p7 = pnand %p2266_p6, %p2399_p4 }
 0x357   : > { %p2272_p12 = por %p2271_p11, %p2270_p10 }
 0x358   : > { %p2268_p9 = pneg %p2267_p7 }
 0x359   : > { %p2274_p0 = por %p2273_p13, %p2272_p12 }
 0x35b   : > { %p2275_p1 = pnand %p2274_p0, %p2268_p9 }
 0x35d   : > { %2278 = shalt.err (!%p2275_p1)
}
 0x35e   : > { %2182 = dma.vmem_to_hbm [thread:$0]  (%p2399_p4), %s2956_s20, 128, %s2954_s25, %s1951_s26  }
 0x35f PF: > { %p2188_p2 = scmp.ge.s32.totalorder %s2329_s14, 2  ;;  %s1977_s8 = sand.u32 1, %s2309_s9  }
 0x360   : > { %s1978_s15 = scalar_lea.sflag [#allocation3], %s1977_s8 }
 0x361   : > { %p2185_p3 = pnand %p2188_p2, %p2406_p8 }
 0x363   : > { %2304 = dma.done.wait (!%p2185_p3), %s1978_s15, 128  }
 0x364   : > { %2306 = vsyncadd (!%p2185_p3), %s1978_s15, 4294967168  ;;  %s15_s14 = sadd.s32 1, %s2329_s14   ;;  %s3007_s9 = smov %s2313_s10 }
 0x365   : > { %p12_p5 = scmp.ge.s32.totalorder %s15_s14, 4   ;;  %s3008_s10 = smov %s2317_s11 }
 0x366   : > { %s3009_s11 = smov %s2412_s22  ;;  %s3010_s12 = smov %s2325_s13 }
 0x367   : > { %s3011_s13 = smov %s3013_s17  ;;  %14 = sbr.rel (!%p12_p5) target bundleno = 4 (0x4), region = 77 }
 0x36e   :  { %1983 = vsyncpa [#allocation3], 1 }
 0x36f   :  { %1985 = vsyncpa [#allocation3 + $0x1], 1 }

</bundles_post_ra>
